<compile_context>
chip_gen: v7x
topology: tpu7x:2x2x1
jax: 0.10.0
libtpu: 0.0.40
codegen_flags: <defaults>
</compile_context>

<pallas_src>
import jax
import jax.numpy as jnp
from jax import lax
from jax.experimental import pallas as pl
from jax.experimental.pallas import tpu as pltpu


def _rdf_kernel(rgb_ref, dep_ref, w3c_ref, b3_ref, mop_ref, out_ref):
    rgb = rgb_ref[...].astype(jnp.float32)      # (Bt, C, HW) lane-dense
    dep = dep_ref[...].astype(jnp.float32)      # (Bt, C, HW)
    hw = rgb.shape[-1]

    # ---- global avg + max pooling: one lane reduce per statistic ----
    inv_hw = 1.0 / float(hw)
    stats_r = jnp.sum(rgb, axis=-1) * inv_hw + jnp.max(rgb, axis=-1)    # (Bt, C)
    stats_d = jnp.sum(dep, axis=-1) * inv_hw + jnp.max(dep, axis=-1)    # (Bt, C)
    stats = jnp.concatenate([stats_r, stats_d], axis=-1)                # (Bt, 2C)

    # ---- conv3: 3x3 conv on a 1x1 map with pad 1 == centre-tap matvec ----
    feat = jnp.dot(stats, w3c_ref[...],
                   preferred_element_type=jnp.float32) + b3_ref[...]    # (Bt, C)

    # ---- mask branch: channel-max -> fused conv1∘conv2 as one MXU matmul ----
    x = jnp.max(dep, axis=1)                                            # (Bt, HW)
    x = jnp.dot(x, mop_ref[...], preferred_element_type=jnp.float32)    # (Bt, HW)
    mask = jax.nn.sigmoid(x)

    # ---- depth_enhance = feature_info * mask + input_rgb (lane-dense store) ----
    out = feat[:, :, None] * mask[:, None, :] + rgb
    out_ref[...] = out.astype(out_ref.dtype)


def rdf_forward(input_rgb, input_depth, w3_full, b3, w1, w2, *, block_b=None):
    B, C, H, W = input_rgb.shape
    HW = H * W
    dn = ("NCHW", "OIHW", "NCHW")

    # Dense fused-operator trick is only valid while HW^2 floats stay small.
    assert HW * HW * 4 <= 8 * 1024 * 1024, (
        "HW too large for the dense fused conv operator; use the roll/halo path")

    # Precompute the fused mask operator: column q of conv2(conv1(.)) applied to
    # the q-th basis image.  Kernel computes x_flat @ mask_op  ==  conv2(conv1(x)).
    # (In practice this is a per-parameter constant; precompute/jit it once.)
    eye_imgs = jnp.eye(HW, dtype=jnp.float32).reshape(HW, 1, H, W)
    t = lax.conv_general_dilated(eye_imgs, w1.astype(jnp.float32), (1, 1),
                                 ((3, 3), (3, 3)), dimension_numbers=dn)
    t = lax.conv_general_dilated(t, w2.astype(jnp.float32), (1, 1),
                                 ((3, 3), (3, 3)), dimension_numbers=dn)
    mask_op = t.reshape(HW, HW)                                  # (HW, HW)

    # conv3 centre tap as a (2C, C) matmul weight (exact for 1x1 input, pad 1).
    w3c = w3_full[:, :, 1, 1].astype(jnp.float32).T              # (2C, C)
    b3_row = b3.reshape(1, C).astype(jnp.float32)

    # Lane-dense flattened image layout for the kernel.
    rgb_f = input_rgb.reshape(B, C, HW)
    dep_f = input_depth.reshape(B, C, HW)

    if block_b is None:
        # Single grid step on single-TC chips (v5e/v6e: extra steps are pure
        # ~0.35us/step overhead at these shapes).  On dual-TC v7x keep >= 2 even
        # steps so the "parallel" batch axis shards across both TensorCores.
        # Per-step VMEM here is tiny, so no further VMEM-driven subdivision.
        kind = ""
        try:
            kind = jax.devices()[0].device_kind.lower()
        except Exception:
            pass
        if "v7" in kind and B >= 2 and B % 2 == 0:
            block_b = B // 2
        else:
            block_b = B
    assert B % block_b == 0
    nb = B // block_b

    out_flat = pl.pallas_call(
        _rdf_kernel,
        out_shape=jax.ShapeDtypeStruct((B, C, HW), input_rgb.dtype),
        grid=(nb,),
        in_specs=[
            pl.BlockSpec((block_b, C, HW), lambda b: (b, 0, 0)),   # rgb (flat)
            pl.BlockSpec((block_b, C, HW), lambda b: (b, 0, 0)),   # depth (flat)
            pl.BlockSpec((2 * C, C), lambda b: (0, 0)),            # conv3 centre-tap weight
            pl.BlockSpec((1, C), lambda b: (0, 0)),                # conv3 bias
            pl.BlockSpec((HW, HW), lambda b: (0, 0)),              # fused conv1∘conv2 operator
        ],
        out_specs=pl.BlockSpec((block_b, C, HW), lambda b: (b, 0, 0)),
        compiler_params=pltpu.CompilerParams(
            dimension_semantics=("parallel",)),
    )(rgb_f, dep_f, w3c, b3_row, mask_op)

    return out_flat.reshape(B, C, H, W)


def rdf_reference(input_rgb, input_depth, w3_full, b3, w1, w2):
    """Pure-JAX reference mirroring the PyTorch forward exactly."""
    dn = ("NCHW", "OIHW", "NCHW")
    rgbd = jnp.concatenate([input_rgb, input_depth], axis=1)
    gmp = jnp.max(rgbd, axis=(2, 3), keepdims=True)
    gap = jnp.mean(rgbd, axis=(2, 3), keepdims=True)
    info = gap + gmp
    feat = lax.conv_general_dilated(info, w3_full, (1, 1), ((1, 1), (1, 1)),
                                    dimension_numbers=dn) + b3.reshape(1, -1, 1, 1)
    x = jnp.max(input_depth, axis=1, keepdims=True)
    x = lax.conv_general_dilated(x, w1, (1, 1), ((3, 3), (3, 3)), dimension_numbers=dn)
    x = lax.conv_general_dilated(x, w2, (1, 1), ((3, 3), (3, 3)), dimension_numbers=dn)
    mask = jax.nn.sigmoid(x)
    return feat * mask + input_rgb


if __name__ == "__main__":
    key = jax.random.PRNGKey(0)
    B, dim, H, W = 2, 4, 16, 16
    k = jax.random.split(key, 6)

    input_rgb = jax.random.normal(k[0], (B, dim, H, W), jnp.float32)
    input_depth = jax.random.normal(k[1], (B, dim, H, W), jnp.float32)

    # Deterministic synthetic parameters (shapes per RDF.__init__).
    w1 = jax.random.normal(k[2], (1, 1, 7, 7), jnp.float32) * 0.1          # conv1 (no bias)
    w2 = jax.random.normal(k[3], (1, 1, 7, 7), jnp.float32) * 0.1          # conv2 (no bias)
    w3 = jax.random.normal(k[4], (dim, 2 * dim, 3, 3), jnp.float32) * 0.1  # conv3 weight
    b3 = jax.random.normal(k[5], (dim,), jnp.float32) * 0.1                # conv3 bias

    out = rdf_forward(input_rgb, input_depth, w3, b3, w1, w2)
    out = jax.block_until_ready(out)

    ref = rdf_reference(input_rgb, input_depth, w3, b3, w1, w2)
    assert out.shape == (B, dim, H, W)
    assert jnp.allclose(out, ref, atol=1e-4, rtol=1e-4), float(jnp.max(jnp.abs(out - ref)))
    print("KERNEL_OK")
</pallas_src>

<mosaic_0001>
module attributes {stable_mosaic.version = 11 : i64} {
  func.func @_rdf_kernel(%arg0: i32, %arg1: memref<2x4x256xf32, #tpu.memory_space<vmem>>, %arg2: memref<2x4x256xf32, #tpu.memory_space<vmem>>, %arg3: memref<8x4xf32, #tpu.memory_space<vmem>>, %arg4: memref<1x4xf32, #tpu.memory_space<vmem>>, %arg5: memref<256x256xf32, #tpu.memory_space<vmem>>, %arg6: memref<2x4x256xf32, #tpu.memory_space<vmem>>) attributes {dimension_semantics = [#tpu.dimension_semantics<parallel>], iteration_bounds = array<i64: 1>, scalar_prefetch = 0 : i64, scratch_operands = 0 : i64, tpu.core_type = #tpu.core_type<tc>, window_params = [{transform_indices = @transform_0, window_bounds = array<i64: 2, 4, 256>}, {transform_indices = @transform_1, window_bounds = array<i64: 2, 4, 256>}, {pipeline_mode = #tpu.pipeline_mode<synchronous>, transform_indices = @transform_2, window_bounds = array<i64: 8, 4>}, {pipeline_mode = #tpu.pipeline_mode<synchronous>, transform_indices = @transform_3, window_bounds = array<i64: 1, 4>}, {pipeline_mode = #tpu.pipeline_mode<synchronous>, transform_indices = @transform_4, window_bounds = array<i64: 256, 256>}, {transform_indices = @transform_5, window_bounds = array<i64: 2, 4, 256>}]} {
    %c0 = arith.constant 0 : index
    %c0_0 = arith.constant 0 : index
    %c0_1 = arith.constant 0 : index
    %0 = vector.load %arg1[%c0, %c0_0, %c0_1] : memref<2x4x256xf32, #tpu.memory_space<vmem>>, vector<2x4x256xf32>
    %c0_2 = arith.constant 0 : index
    %c0_3 = arith.constant 0 : index
    %c0_4 = arith.constant 0 : index
    %1 = vector.load %arg2[%c0_2, %c0_3, %c0_4] : memref<2x4x256xf32, #tpu.memory_space<vmem>>, vector<2x4x256xf32>
    %cst = arith.constant dense<0.000000e+00> : vector<2x4xf32>
    %2 = vector.multi_reduction <add>, %0, %cst [2] : vector<2x4x256xf32> to vector<2x4xf32>
    %cst_5 = arith.constant 3.906250e-03 : f32
    %3 = vector.broadcast %cst_5 : f32 to vector<2x4xf32>
    %4 = arith.mulf %2, %3 : vector<2x4xf32>
    %cst_6 = arith.constant dense<0xFF800000> : vector<2x4xf32>
    %5 = vector.multi_reduction <maximumf>, %0, %cst_6 [2] : vector<2x4x256xf32> to vector<2x4xf32>
    %6 = arith.addf %4, %5 : vector<2x4xf32>
    %cst_7 = arith.constant dense<0.000000e+00> : vector<2x4xf32>
    %7 = vector.multi_reduction <add>, %1, %cst_7 [2] : vector<2x4x256xf32> to vector<2x4xf32>
    %cst_8 = arith.constant 3.906250e-03 : f32
    %8 = vector.broadcast %cst_8 : f32 to vector<2x4xf32>
    %9 = arith.mulf %7, %8 : vector<2x4xf32>
    %cst_9 = arith.constant dense<0xFF800000> : vector<2x4xf32>
    %10 = vector.multi_reduction <maximumf>, %1, %cst_9 [2] : vector<2x4x256xf32> to vector<2x4xf32>
    %11 = arith.addf %9, %10 : vector<2x4xf32>
    %12 = tpu.concatenate %6, %11 in 1 : vector<2x4xf32>, vector<2x4xf32> -> vector<2x8xf32>
    %c0_10 = arith.constant 0 : index
    %c0_11 = arith.constant 0 : index
    %13 = vector.load %arg3[%c0_10, %c0_11] : memref<8x4xf32, #tpu.memory_space<vmem>>, vector<8x4xf32>
    %cst_12 = arith.constant dense<0.000000e+00> : vector<2x4xf32>
    %14 = tpu.matmul %12, %13, %cst_12 {dimension_numbers = #tpu.dot_dimension_numbers<[1], [0], [0], [1], [0, 0, 1, 1], [], []>} : vector<2x8xf32>, vector<8x4xf32>, vector<2x4xf32> -> vector<2x4xf32>
    %c0_13 = arith.constant 0 : index
    %c0_14 = arith.constant 0 : index
    %15 = vector.load %arg4[%c0_13, %c0_14] : memref<1x4xf32, #tpu.memory_space<vmem>>, vector<1x4xf32>
    %16 = vector.broadcast %15 : vector<1x4xf32> to vector<2x4xf32>
    %17 = arith.addf %14, %16 : vector<2x4xf32>
    %cst_15 = arith.constant dense<0xFF800000> : vector<2x256xf32>
    %18 = vector.multi_reduction <maximumf>, %1, %cst_15 [1] : vector<2x4x256xf32> to vector<2x256xf32>
    %c0_16 = arith.constant 0 : index
    %c0_17 = arith.constant 0 : index
    %19 = vector.load %arg5[%c0_16, %c0_17] : memref<256x256xf32, #tpu.memory_space<vmem>>, vector<256x256xf32>
    %cst_18 = arith.constant dense<0.000000e+00> : vector<2x256xf32>
    %20 = tpu.matmul %18, %19, %cst_18 {dimension_numbers = #tpu.dot_dimension_numbers<[1], [0], [0], [1], [0, 0, 1, 1], [], []>} : vector<2x256xf32>, vector<256x256xf32>, vector<2x256xf32> -> vector<2x256xf32>
    %21 = arith.negf %20 : vector<2x256xf32>
    %22 = math.exp %21 : vector<2x256xf32>
    %cst_19 = arith.constant 1.000000e+00 : f32
    %23 = vector.broadcast %cst_19 : f32 to vector<2x256xf32>
    %24 = arith.addf %23, %22 : vector<2x256xf32>
    %25 = arith.divf %23, %24 : vector<2x256xf32>
    %26 = vector.shape_cast %17 : vector<2x4xf32> to vector<2x4x1xf32>
    %27 = vector.shape_cast %25 : vector<2x256xf32> to vector<2x1x256xf32>
    %28 = vector.broadcast %26 : vector<2x4x1xf32> to vector<2x4x256xf32>
    %29 = vector.broadcast %27 : vector<2x1x256xf32> to vector<2x4x256xf32>
    %30 = arith.mulf %28, %29 : vector<2x4x256xf32>
    %31 = arith.addf %30, %0 : vector<2x4x256xf32>
    %c0_20 = arith.constant 0 : index
    %c0_21 = arith.constant 0 : index
    %c0_22 = arith.constant 0 : index
    %32 = vector.load %arg6[%c0_20, %c0_21, %c0_22] : memref<2x4x256xf32, #tpu.memory_space<vmem>>, vector<2x4x256xf32>
    tpu.vector_store %arg6[%c0_20, %c0_21, %c0_22], %31 {strides = array<i32>} : memref<2x4x256xf32, #tpu.memory_space<vmem>>, vector<2x4x256xf32>,
    return
  }
  func.func @transform_0(%arg0: i32) -> (i32, i32, i32) {
    %c0_i32 = arith.constant 0 : i32
    %c0_i32_0 = arith.constant 0 : i32
    %c0_i32_1 = arith.constant 0 : i32
    return %arg0, %c0_i32, %c0_i32_0 : i32, i32, i32
  }
  func.func @transform_1(%arg0: i32) -> (i32, i32, i32) {
    %c0_i32 = arith.constant 0 : i32
    %c0_i32_0 = arith.constant 0 : i32
    %c0_i32_1 = arith.constant 0 : i32
    return %arg0, %c0_i32, %c0_i32_0 : i32, i32, i32
  }
  func.func @transform_2(%arg0: i32) -> (i32, i32) {
    %c0_i32 = arith.constant 0 : i32
    %c0_i32_0 = arith.constant 0 : i32
    %c0_i32_1 = arith.constant 0 : i32
    return %c0_i32, %c0_i32_0 : i32, i32
  }
  func.func @transform_3(%arg0: i32) -> (i32, i32) {
    %c0_i32 = arith.constant 0 : i32
    %c0_i32_0 = arith.constant 0 : i32
    %c0_i32_1 = arith.constant 0 : i32
    return %c0_i32, %c0_i32_0 : i32, i32
  }
  func.func @transform_4(%arg0: i32) -> (i32, i32) {
    %c0_i32 = arith.constant 0 : i32
    %c0_i32_0 = arith.constant 0 : i32
    %c0_i32_1 = arith.constant 0 : i32
    return %c0_i32, %c0_i32_0 : i32, i32
  }
  func.func @transform_5(%arg0: i32) -> (i32, i32, i32) {
    %c0_i32 = arith.constant 0 : i32
    %c0_i32_0 = arith.constant 0 : i32
    %c0_i32_1 = arith.constant 0 : i32
    return %arg0, %c0_i32, %c0_i32_0 : i32, i32, i32
  }
}

</mosaic_0001>

<bundles_post_ra>
// kernel: tpu_custom_call.1
= control target key start
LH: loop header
LB: loop body
LE: loop exit
PB: predicated region body
PF: predicated region fallthrough
CT: control target
= control target key end

     0   :  { %10 = vsyncpa [#allocation3], 0  ;;  %s863_s0 = inlined_call_operand.hbm [shape: f32[2,4,256], index: 0, kind: input, shape index: {}]   ;;  %s864_s1 = inlined_call_operand.hbm [shape: f32[2,4,256], index: 1, kind: input, shape index: {}]   ;;  %s865_s2 = inlined_call_operand.vmem [shape: f32[8,4], index: 2, kind: input, shape index: {}]   ;;  %s866_s3 = inlined_call_operand.vmem [shape: f32[1,4], index: 3, kind: input, shape index: {}]   ;;  %s867_s4 = inlined_call_operand.hbm [shape: f32[256,256], index: 4, kind: input, shape index: {}]   ;;  %s868_s5 = inlined_call_operand.hbm [shape: f32[2,4,256], index: 5, kind: output, shape index: {}]  }
   0x1   :  { %11 = vsyncpa [#allocation6], 0 }
   0x2   :  { %12 = vsyncpa [#allocation4], 0  ;;  %s705_s18 = smov [#allocation5]   ;;  %s706_s20 = smov [#allocation2]  }
   0x3   :  { %s30_s19 = sshll.u32 %s705_s18, 4  ;;  %s18_s21 = sshll.u32 %s706_s20, 4  ;;  %s31_s19 = int_to_ptr.vmem [resolvable:$true] %s30_s19  ;;  %s746_s21 = int_to_ptr.vmem [resolvable:$true] %s18_s21 }
   0x4   :  { %s611_s24 = scalar_lea.hbm %s864_s1, 256 }
   0x5   :  { %p612_p0 = scmp.ne.s32.totalorder %s864_s1, %s611_s24  ;;  %p615_p1 = scmp.lt.u32.totalorder %s611_s24, %s864_s1 }
   0x7   :  { %p617_p2 = pnand %p615_p1, %p612_p0 }
   0x9   :  { %620 = shalt.err (!%p617_p2)
}
   0xa   :  { %s621_s29 = scalar_lea.vmem %s31_s19, 256  ;;  %p626_p4 = scmp.lt.s32.totalorder %s31_s19, %s31_s19 }
   0xb   :  { %p622_p3 = scmp.ne.s32.totalorder %s31_s19, %s621_s29  ;;  %p627_p5 = scmp.lt.s32.totalorder %s621_s29, %s621_s29 }
   0xd   :  { %p628_p6 = por %p627_p5, %p626_p4 }
   0xf   :  { %p629_p7 = pnand %p628_p6, %p622_p3 }
  0x11   :  { %632 = shalt.err (!%p629_p7)
}
  0x12   :  { %s707_s30 = smov 128   ;;  %s708_s6 = smov 8  }
  0x13   :  { %36 = dma.hbm_to_vmem [thread:$0]  %s864_s1, 256, %s31_s19, [#allocation6], %s707_s30, %s707_s30, %s708_s6  }
  0x14   :  { %s633_s11 = scalar_lea.hbm %s863_s0, 256 }
  0x15   :  { %p634_p8 = scmp.ne.s32.totalorder %s863_s0, %s633_s11  ;;  %p637_p9 = scmp.lt.u32.totalorder %s633_s11, %s863_s0 }
  0x17   :  { %p639_p10 = pnand %p637_p9, %p634_p8 }
  0x19   :  { %642 = shalt.err (!%p639_p10)
}
  0x1a   :  { %s643_s16 = scalar_lea.vmem %s746_s21, 256  ;;  %p648_p12 = scmp.lt.s32.totalorder %s746_s21, %s746_s21 }
  0x1b   :  { %p644_p11 = scmp.ne.s32.totalorder %s746_s21, %s643_s16  ;;  %p649_p13 = scmp.lt.s32.totalorder %s643_s16, %s643_s16 }
  0x1d   :  { %p650_p0 = por %p649_p13, %p648_p12 }
  0x1f   :  { %p651_p1 = pnand %p650_p0, %p644_p11 }
  0x21   :  { %654 = shalt.err (!%p651_p1)
}
  0x22   :  { %24 = dma.hbm_to_vmem [thread:$0]  %s863_s0, 256, %s746_s21, [#allocation3], %s707_s30, %s707_s30, %s708_s6  }
  0x23   :  { %s709_s18 = smov [#allocation7]   ;;  %s655_s23 = scalar_lea.hbm %s867_s4, 8192 }
  0x24   :  { %s46_s19 = sshll.u32 %s709_s18, 4  ;;  %p656_p2 = scmp.ne.s32.totalorder %s867_s4, %s655_s23  ;;  %s47_s19 = int_to_ptr.vmem [resolvable:$true] %s46_s19 }
  0x25   :  { %p659_p3 = scmp.lt.u32.totalorder %s655_s23, %s867_s4 }
  0x27   :  { %p661_p4 = pnand %p659_p3, %p656_p2 }
  0x29   :  { %664 = shalt.err (!%p661_p4)
}
  0x2a   :  { %s665_s28 = scalar_lea.vmem %s47_s19, 8192  ;;  %p670_p6 = scmp.lt.s32.totalorder %s47_s19, %s47_s19 }
  0x2b   :  { %p666_p5 = scmp.ne.s32.totalorder %s47_s19, %s665_s28  ;;  %p671_p7 = scmp.lt.s32.totalorder %s665_s28, %s665_s28 }
  0x2d   :  { %p672_p8 = por %p671_p7, %p670_p6 }
  0x2f   :  { %p673_p9 = pnand %p672_p8, %p666_p5 }
  0x31   :  { %676 = shalt.err (!%p673_p9)
}
  0x32   :  { %s710_s0 = smov 256   ;;  %s711_s21 = smov 16  }
  0x33   :  { %52 = dma.hbm_to_vmem [thread:$0]  %s867_s4, 8192, %s47_s19, [#allocation6], %s710_s0, %s710_s0, %s711_s21  }
  0x34   :  { %699 = dma.done.wait [#allocation3], 256  }
  0x35   :  { %700 = vsyncadd [#allocation3], 4294967040 }
  0x36   :  { %701 = dma.done.wait [#allocation6], 8448  }
  0x37   :  { %702 = vsyncadd [#allocation6], 4294958848  ;;  %vm72_vm0 = vcmask 1043456   ;;  %v64_v0 = vld [vmem:[#allocation5] sm:$0xff]  ;;  %v795_v1 = vld [vmem:[#allocation2] sm:$0xff]  ;;  %v712_v47 = vmov 0.0  }
  0x38   :  { %v65_v2 = vld [vmem:[#allocation5 + $0x8] sm:$0xff]  ;;  %v99_v3 = vcombine.high %v64_v0, %v64_v0  ;;  %v103_v4 = vsel %vm72_vm0, %v64_v0, 0.0  ;;  %v800_v5 = vcombine.high %v795_v1, %v795_v1  ;;  %v73_v6 = vsel %vm72_vm0, %v795_v1, 0.0  ;;  %v804_v7 = vld [vmem:[#allocation2 + $0x8] sm:$0xff]  ;;  %v157_v46 = vld [vmem:[%s865_s2] sm:$0xff]  ;;  %519 = vmatprep.subr.mxu0 %v712_v47  ;;  %s715_s10 = smov [#allocation8]  }
  0x39   :  { %v100_v8 = vcombine.high %v65_v2, %v65_v2  ;;  %v808_v9 = vcombine.high %v804_v7, %v804_v7  ;;  %v108_v12 = vsel %vm72_vm0, %v65_v2, 0.0  ;;  %v78_v13 = vsel %vm72_vm0, %v804_v7, 0.0  ;;  %520 = vmatpush3.msra.mxu0 %v157_v46  ;;  %v264_v48 = vld [vmem:[#allocation7 + $0x8] sm:$0xff]  ;;  %v266_v49 = vld [vmem:[#allocation7 + $0x18] sm:$0xff]  ;;  %v263_v50 = vld [vmem:[#allocation7] sm:$0xff]  ;;  %s500_s11 = sshll.u32 %s715_s10, 4  ;;  %s501_s11 = int_to_ptr.vmem [resolvable:$true] %s500_s11 }
  0x3a   :  { %v104_v10 = vsel %vm72_vm0, %v99_v3, 0.0  ;;  %v74_v11 = vsel %vm72_vm0, %v800_v5, 0.0  ;;  %v90_v20 = vsel %vm72_vm0, %v804_v7, -inf  ;;  %v85_v22 = vsel %vm72_vm0, %v795_v1, -inf  ;;  %v265_v56 = vld [vmem:[#allocation7 + $0x10] sm:$0xff]  ;;  %v268_v57 = vld [vmem:[#allocation7 + $0x28] sm:$0xff]  ;;  %p682_p11 = scmp.lt.s32.totalorder %s501_s11, %s501_s11 }
  0x3b   :  { %v105_v14 = vadd.f32 %v104_v10, %v103_v4  ;;  %v75_v15 = vadd.f32 %v74_v11, %v73_v6  ;;  %v109_v16 = vsel %vm72_vm0, %v100_v8, 0.0  ;;  %v79_v17 = vsel %vm72_vm0, %v808_v9, 0.0  ;;  %v270_v58 = vld [vmem:[#allocation7 + $0x38] sm:$0xff]  ;;  %v267_v61 = vld [vmem:[#allocation7 + $0x20] sm:$0xff]  ;;  %v269_v62 = vld [vmem:[#allocation7 + $0x30] sm:$0xff] }
  0x3c   :  { %v110_v18 = vadd.f32 %v109_v16, %v108_v12  ;;  %v80_v19 = vadd.f32 %v79_v17, %v78_v13  ;;  %v91_v21 = vsel %vm72_vm0, %v808_v9, -inf  ;;  %v86_v23 = vsel %vm72_vm0, %v800_v5, -inf  ;;  %v272_v63 = vld [vmem:[#allocation7 + $0x48] sm:$0xff]  ;;  %v271_v13 = vld [vmem:[#allocation7 + $0x40] sm:$0xff]  ;;  %v278_v17 = vld [vmem:[#allocation7 + $0x78] sm:$0xff] }
  0x3d   :  { %106 = vadd.xlane.f32.xlu1 %v105_v14  ;;  %76 = vadd.xlane.f32.xlu0 %v75_v15  ;;  %v92_v24 = vmax.f32 %v90_v20, %v91_v21  ;;  %v87_v25 = vmax.f32 %v85_v22, %v86_v23  ;;  %v120_v26 = vsel %vm72_vm0, %v65_v2, -inf  ;;  %v121_v27 = vsel %vm72_vm0, %v100_v8, -inf  ;;  %v273_v14 = vld [vmem:[#allocation7 + $0x50] sm:$0xff]  ;;  %v276_v16 = vld [vmem:[#allocation7 + $0x68] sm:$0xff]  ;;  %v275_v21 = vld [vmem:[#allocation7 + $0x60] sm:$0xff] }
  0x3e   :  { %v115_v28 = vsel %vm72_vm0, %v64_v0, -inf  ;;  %v116_v29 = vsel %vm72_vm0, %v99_v3, -inf  ;;  %v122_v30 = vmax.f32 %v120_v26, %v121_v27  ;;  %v251_v32 = vrot.slane %v120_v26, 4  ;;  %v274_v3 = vld [vmem:[#allocation7 + $0x58] sm:$0xff]  ;;  %v277_v22 = vld [vmem:[#allocation7 + $0x70] sm:$0xff]  ;;  %v280_v23 = vld [vmem:[#allocation7 + $0x88] sm:$0xff] }
  0x3f   :  { %v117_v31 = vmax.f32 %v115_v28, %v116_v29  ;;  %v239_v33 = vrot.slane %v115_v28, 4  ;;  %v257_v35 = vrot.slane %v121_v27, 4  ;;  %v245_v37 = vrot.slane %v116_v29, 4  ;;  %v293_v46 = vld [vmem:[#allocation7 + $0xf0] sm:$0xff] }
  0x40   :  { %v252_v34 = vmax.f32 %v120_v26, %v251_v32  ;;  %vm713_vm1 = vmmov 0   ;;  %v524_v55 = vpack.c.bf16 %v266_v49, %v264_v48  ;;  %v526_v59 = vpack.c.bf16 %v265_v56, %v263_v50  ;;  %v298_v48 = vld [vmem:[#allocation7 + $0x118] sm:$0xff] }
  0x41   :  { %111 = vadd.xlane.f32.xlu1 %v110_v18  ;;  %81 = vadd.xlane.f32.xlu0 %v80_v19  ;;  %v240_v36 = vmax.f32 %v115_v28, %v239_v33  ;;  %v258_v39 = vmax.f32 %v121_v27, %v257_v35  ;;  %v246_v41 = vmax.f32 %v116_v29, %v245_v37  ;;  %vm139_vm2 = vcmask 1041409   ;;  %v279_v27 = vld [vmem:[#allocation7 + $0x80] sm:$0xff]  ;;  %v281_v28 = vld [vmem:[#allocation7 + $0x90] sm:$0xff]  ;;  %v284_v29 = vld [vmem:[#allocation7 + $0xa8] sm:$0xff] }
  0x42   :  { %v253_v38 = vrot.slane %v252_v34, 2  ;;  %521 = vmatprep.mubr.msk.f32.mxu0 %vm713_vm1, %v712_v47  ;;  %v528_v60 = vpack.c.bf16 %v270_v58, %v268_v57  ;;  %525 = vmatprep.subr.bf16.mxu1 %v524_v55  ;;  %v530_v8 = vpack.c.bf16 %v269_v62, %v267_v61  ;;  %v532_v12 = vpack.c.bf16 %v274_v3, %v272_v63  ;;  %v283_v33 = vld [vmem:[#allocation7 + $0xa0] sm:$0xff]  ;;  %v288_v35 = vld [vmem:[#allocation7 + $0xc8] sm:$0xff]  ;;  %v301_v58 = vld [vmem:[#allocation7 + $0x130] sm:$0xff] }
  0x43   :  { %v241_v40 = vrot.slane %v240_v36, 2  ;;  %v259_v43 = vrot.slane %v258_v39, 2  ;;  %v247_v45 = vrot.slane %v246_v41, 2  ;;  %527 = vmatpush1.bf16.msra.mxu1 %v526_v59  ;;  %v534_v19 = vpack.c.bf16 %v273_v14, %v271_v13  ;;  %v296_v47 = vld [vmem:[#allocation7 + $0x108] sm:$0xff]  ;;  %v299_v57 = vld [vmem:[#allocation7 + $0x120] sm:$0xff]  ;;  %v310_v3 = vld [vmem:[#allocation7 + $0x178] sm:$0xff] }
  0x44   :  { %v254_v42 = vmax.f32 %v252_v34, %v253_v38  ;;  %529 = vmatprep.subr.bf16.mxu1 %v528_v60  ;;  %v536_v20 = vpack.c.bf16 %v278_v17, %v276_v16  ;;  %v285_v34 = vld [vmem:[#allocation7 + $0xb0] sm:$0xff]  ;;  %v556_v50 = vpack.c.bf16 %v298_v48, %v296_v47  ;;  %v304_v59 = vld [vmem:[#allocation7 + $0x148] sm:$0xff]  ;;  %v306_v60 = vld [vmem:[#allocation7 + $0x158] sm:$0xff]  ;;  %v562_v61 = vpack.c.bf16 %v301_v58, %v299_v57 }
  0x45   :  { %93 = vmax.xlane.f32.xlu1 %v92_v24  ;;  %88 = vmax.xlane.f32.xlu0 %v87_v25  ;;  %v242_v44 = vmax.f32 %v240_v36, %v241_v40  ;;  %v248_v51 = vmax.f32 %v246_v41, %v247_v45  ;;  %v260_v52 = vmax.f32 %v258_v39, %v259_v43  ;;  %v282_v24 = vld [vmem:[#allocation7 + $0x98] sm:$0xff]  ;;  %v287_v39 = vld [vmem:[#allocation7 + $0xc0] sm:$0xff]  ;;  %v289_v40 = vld [vmem:[#allocation7 + $0xd0] sm:$0xff]  ;;  %vm155_vm3 = vcmask 31744  }
  0x46   :  { %v255_v54 = vrot.slane %v254_v42, 1  ;;  %v538_v25 = vpack.c.bf16 %v277_v22, %v275_v21  ;;  %v540_v26 = vpack.c.bf16 %v282_v24, %v280_v23  ;;  %v290_v36 = vld [vmem:[#allocation7 + $0xd8] sm:$0xff]  ;;  %v546_v37 = vpack.c.bf16 %v285_v34, %v283_v33  ;;  %v292_v41 = vld [vmem:[#allocation7 + $0xe8] sm:$0xff]  ;;  %v291_v45 = vld [vmem:[#allocation7 + $0xe0] sm:$0xff] }
  0x47   :  { %v243_v53 = vrot.slane %v242_v44, 1  ;;  %v249_v0 = vrot.slane %v248_v51, 1  ;;  %v261_v2 = vrot.slane %v260_v52, 1  ;;  %531 = vmatpush1.bf16.msra.mxu1 %v530_v8  ;;  %v548_v38 = vpack.c.bf16 %v290_v36, %v288_v35  ;;  %v303_v63 = vld [vmem:[#allocation7 + $0x140] sm:$0xff]  ;;  %v313_v17 = vld [vmem:[#allocation7 + $0x190] sm:$0xff]  ;;  %v320_v24 = vld [vmem:[#allocation7 + $0x1c8] sm:$0xff] }
  0x48   :  { %v256_v6 = vmax.f32 %v254_v42, %v255_v54  ;;  %533 = vmatprep.subr.bf16.mxu1 %v532_v12  ;;  %v294_v42 = vld [vmem:[#allocation7 + $0xf8] sm:$0xff]  ;;  %v550_v43 = vpack.c.bf16 %v289_v40, %v287_v39  ;;  %v554_v49 = vpack.c.bf16 %v293_v46, %v291_v45  ;;  %v564_v62 = vpack.c.bf16 %v306_v60, %v304_v59  ;;  %v307_v8 = vld [vmem:[#allocation7 + $0x160] sm:$0xff]  ;;  %v317_v23 = vld [vmem:[#allocation7 + $0x1b0] sm:$0xff] }
  0x49   :  { %123 = vmax.xlane.f32.xlu1 %v122_v30  ;;  %118 = vmax.xlane.f32.xlu0 %v117_v31  ;;  %v244_v4 = vmax.f32 %v242_v44, %v243_v53  ;;  %v250_v10 = vmax.f32 %v248_v51, %v249_v0  ;;  %v262_v11 = vmax.f32 %v260_v52, %v261_v2  ;;  %v286_v30 = vld [vmem:[#allocation7 + $0xb8] sm:$0xff]  ;;  %v295_v51 = vld [vmem:[#allocation7 + $0x100] sm:$0xff]  ;;  %v297_v52 = vld [vmem:[#allocation7 + $0x110] sm:$0xff]  ;;  %v129_v39 = vlaneseq }
  0x4a   :  { %v542_v31 = vpack.c.bf16 %v281_v28, %v279_v27  ;;  %v544_v32 = vpack.c.bf16 %v286_v30, %v284_v29  ;;  %v552_v44 = vpack.c.bf16 %v294_v42, %v292_v41  ;;  %v300_v53 = vld [vmem:[#allocation7 + $0x128] sm:$0xff]  ;;  %v302_v54 = vld [vmem:[#allocation7 + $0x138] sm:$0xff]  ;;  %v558_v55 = vpack.c.bf16 %v297_v52, %v295_v51  ;;  %v305_v0 = vld [vmem:[#allocation7 + $0x150] sm:$0xff] }
  0x4b   :  { %v835_v15 = vsel %vm139_vm2, %v256_v6, %v244_v4  ;;  %v332_v18 = vsel %vm139_vm2, %v262_v11, %v250_v10  ;;  %535 = vmatpush1.bf16.msra.mxu1 %v534_v19  ;;  %v560_v56 = vpack.c.bf16 %v302_v54, %v300_v53  ;;  %v308_v2 = vld [vmem:[#allocation7 + $0x168] sm:$0xff]  ;;  %v566_v4 = vpack.c.bf16 %v305_v0, %v303_v63  ;;  %v309_v10 = vld [vmem:[#allocation7 + $0x170] sm:$0xff]  ;;  %v314_v12 = vld [vmem:[#allocation7 + $0x198] sm:$0xff] }
  0x4c   :  { %399 = vmatprep.mubr.f32.mxu1 %v332_v18  ;;  %537 = vmatprep.subr.bf16.mxu1 %v536_v20  ;;  %v568_v6 = vpack.c.bf16 %v310_v3, %v308_v2  ;;  %v312_v11 = vld [vmem:[#allocation7 + $0x188] sm:$0xff]  ;;  %v570_v13 = vpack.c.bf16 %v309_v10, %v307_v8  ;;  %v311_v16 = vld [vmem:[#allocation7 + $0x180] sm:$0xff]  ;;  %v318_v19 = vld [vmem:[#allocation7 + $0x1b8] sm:$0xff]  ;;  %v130_v42 = vand.u32 127, %v129_v39  ;;  %vm165_vm4 = vcmask 64512  }
  0x4d   :  { %v572_v14 = vpack.c.bf16 %v314_v12, %v312_v11  ;;  %v316_v18 = vld [vmem:[#allocation7 + $0x1a8] sm:$0xff]  ;;  %v574_v20 = vpack.c.bf16 %v313_v17, %v311_v16  ;;  %v315_v22 = vld [vmem:[#allocation7 + $0x1a0] sm:$0xff]  ;;  %v321_v29 = vld [vmem:[#allocation7 + $0x1d0] sm:$0xff] }
  0x4e   :  { %v576_v21 = vpack.c.bf16 %v318_v19, %v316_v18  ;;  %v319_v28 = vld [vmem:[#allocation7 + $0x1c0] sm:$0xff]  ;;  %v324_v30 = vld [vmem:[#allocation7 + $0x1e8] sm:$0xff]  ;;  %v325_v35 = vld [vmem:[#allocation7 + $0x1f0] sm:$0xff]  ;;  %v144_v46 = vadd.s32 4294967292, %v130_v42 }
  0x4f   :  { %539 = vmatpush1.bf16.msra.mxu1 %v538_v25  ;;  %v322_v25 = vld [vmem:[#allocation7 + $0x1d8] sm:$0xff]  ;;  %v323_v34 = vld [vmem:[#allocation7 + $0x1e0] sm:$0xff] }
  0x50   :  { %541 = vmatprep.subr.bf16.mxu1 %v540_v26  ;;  %v578_v26 = vpack.c.bf16 %v317_v23, %v315_v22  ;;  %v580_v27 = vpack.c.bf16 %v322_v25, %v320_v24  ;;  %v586_v36 = vpack.c.bf16 %v325_v35, %v323_v34 }
  0x53   :  { %543 = vmatpush1.bf16.msra.mxu1 %v542_v31  ;;  %v326_v31 = vld [vmem:[#allocation7 + $0x1f8] sm:$0xff] }
  0x54   :  { %545 = vmatprep.subr.bf16.mxu1 %v544_v32  ;;  %v582_v32 = vpack.c.bf16 %v321_v29, %v319_v28  ;;  %v584_v33 = vpack.c.bf16 %v326_v31, %v324_v30  ;;  %v513_v31 = vld [vmem:[%s866_s3] ss:$0 sm:$0xff]  ;;  %s677_s3 = scalar_lea.vmem %s501_s11, 256 }
  0x55   :  { %p678_p10 = scmp.ne.s32.totalorder %s501_s11, %s677_s3  ;;  %p683_p12 = scmp.lt.s32.totalorder %s677_s3, %s677_s3 }
  0x57   :  { %547 = vmatpush1.bf16.msra.mxu1 %v546_v37  ;;  %p684_p13 = por %p683_p12, %p682_p11 }
  0x58   :  { %549 = vmatprep.subr.bf16.mxu1 %v548_v38 }
  0x59   :  { %p685_p0 = pnand %p684_p13, %p678_p10 }
  0x5b   :  { %551 = vmatpush1.bf16.msra.mxu1 %v550_v43  ;;  %v132_v43 = vshrl.u32 %v129_v39, 7 }
  0x5c   :  { %553 = vmatprep.subr.bf16.mxu1 %v552_v44 }
  0x5d   :  { %v147_v54 = vsub.s32 %v144_v46, %v132_v43  ;;  %v427_v23 = vsub.s32 1, %v132_v43  ;;  %v420_v24 = vsub.s32 0, %v132_v43 }
  0x5f   :  { %555 = vmatpush1.bf16.msra.mxu1 %v554_v49  ;;  %v133_v49 = vsub.s32 %v130_v42, %v132_v43 }
  0x60   :  { %557 = vmatprep.subr.bf16.mxu1 %v556_v50 }
  0x63   :  { %559 = vmatpush1.bf16.msra.mxu1 %v558_v55 }
  0x64   :  { %561 = vmatprep.subr.bf16.mxu1 %v560_v56 }
  0x67   :  { %563 = vmatpush1.bf16.msra.mxu1 %v562_v61 }
  0x68   :  { %565 = vmatprep.subr.bf16.mxu1 %v564_v62 }
  0x6b   :  { %567 = vmatpush1.bf16.msra.mxu1 %v566_v4 }
  0x6c   :  { %569 = vmatprep.subr.bf16.mxu1 %v568_v6 }
  0x6f   :  { %571 = vmatpush1.bf16.msra.mxu1 %v570_v13  ;;  %v714_v13 = vmov 1966171168  }
  0x70   :  { %573 = vmatprep.subr.bf16.mxu1 %v572_v14  ;;  %v436_v14 = vunpack.c.l.s4 %v714_v13 }
  0x72   :  { %v437_v16 = vunpack.c.0.s8 %v436_v14 }
  0x73   :  { %575 = vmatpush1.bf16.msra.mxu1 %v574_v20 }
  0x74   :  { %577 = vmatprep.subr.bf16.mxu1 %v576_v21  ;;  %v440_v18 = vsub.s32 %v437_v16, %v132_v43 }
  0x77   :  { %579 = vmatpush1.bf16.msra.mxu1 %v578_v26 }
  0x78   :  { %581 = vmatprep.subr.bf16.mxu1 %v580_v27 }
  0x7b   :  { %583 = vmatpush1.bf16.msra.mxu1 %v582_v32 }
  0x7c   :  { %585 = vmatprep.subr.bf16.mxu1 %v584_v33 }
  0x7f   :  { %587 = vmatpush1.bf16.msra.mxu1 %v586_v36 }
  0x82   :  { %400 = vmatmul.mubr.f32.vlgmr.msra.gmra.mrb[0].mxu1 %v835_v15 }
  0xca   :  { %v107_v37 = vpop.xlane.xlu1 %106  ;;  %v77_v38 = vpop.xlane.xlu0 %76 }
  0xcb   :  { %v83_v44 = vmul.f32 0.00390625, %v77_v38  ;;  %v113_v52 = vmul.f32 0.00390625, %v107_v37 }
  0xce   :  { %v112_v40 = vpop.xlane.xlu1 %111  ;;  %v82_v41 = vpop.xlane.xlu0 %81 }
  0xcf   :  { %v84_v45 = vmul.f32 0.00390625, %v82_v41  ;;  %v114_v53 = vmul.f32 0.00390625, %v112_v40 }
  0xd2   :  { %v94_v47 = vpop.xlane.xlu1 %93  ;;  %v89_v48 = vpop.xlane.xlu0 %88 }
  0xd3   :  { %v96_v50 = vadd.f32 %v94_v47, %v84_v45  ;;  %v95_v51 = vadd.f32 %v89_v48, %v83_v44 }
  0xd5   :  { %v138_v56 = vrot.slane %v96_v50, %v133_v49  ;;  %v134_v57 = vrot.slane %v95_v51, %v133_v49 }
  0xd6   :  { %v124_v55 = vpop.xlane.xlu1 %123  ;;  %v119_v15 = vpop.xlane.xlu0 %118 }
  0xd7   :  { %v126_v58 = vadd.f32 %v124_v55, %v114_v53  ;;  %v125_v59 = vadd.f32 %v119_v15, %v113_v52  ;;  %v140_v62 = vsel %vm139_vm2, %v138_v56, %v134_v57 }
  0xd9   :  { %v152_v60 = vrot.slane %v126_v58, %v147_v54  ;;  %v148_v61 = vrot.slane %v125_v59, %v147_v54 }
  0xdb   :  { %v153_v63 = vsel %vm139_vm2, %v152_v60, %v148_v61 }
  0xdc   :  { %v156_v0 = vsel %vm155_vm3, %v140_v62, %v153_v63 }
  0xdd   :  { %522 = vmatmul.mubr.msk.f32.vlgmr.msra.gmra.mrb[0].mxu0 %vm165_vm4, %v156_v0 }
 0x155   :  { %v401_v2 = vpop.f32.mrb[0].mxu1 }
 0x156   :  { %v515_v3 = vmul.f32 -1.442695, %v401_v2  ;;  %v403_v4 = vpop.f32.mrb[1].mxu1 }
 0x157   :  { %v516_v6 = vmul.f32 -1.442695, %v403_v4 }
 0x158   :  { %603 = vpow2.f32 %v515_v3 }
 0x159   :  { %605 = vpow2.f32 %v516_v6 }
 0x162   :  { %v604_v8 = vpop.eup %603 }
 0x163   :  { %v606_v10 = vpop.eup %605  ;;  %v412_v11 = vadd.f32 1.0, %v604_v8 }
 0x164   :  { %v413_v12 = vadd.f32 1.0, %v606_v10 }
 0x165   :  { %607 = vrcp.f32 %v412_v11 }
 0x166   :  { %609 = vrcp.f32 %v413_v12 }
 0x16f   :  { %v608_v17 = vpop.eup %607 }
 0x170   :  { %v610_v19 = vpop.eup %609 }
 0x171   :  { %v434_v20 = vcombine.low %v608_v17, %v610_v19 }
 0x173   :  { %v441_v21 = vrot.slane %v434_v20, %v440_v18 }
 0x175   :  { %v442_v22 = vcombine.high %v441_v21, %v441_v21  ;;  %v449_v28 = vrot.slane %v441_v21, %v440_v18 }
 0x177   :  { %v456_v25 = vrot.slane %v442_v22, %v440_v18  ;;  %v460_v29 = vrot.slane %v449_v28, %v420_v24  ;;  %v464_v30 = vrot.slane %v449_v28, %v427_v23 }
 0x179   :  { %v468_v26 = vrot.slane %v456_v25, %v420_v24  ;;  %v472_v27 = vrot.slane %v456_v25, %v427_v23 }
 0x1b0   :  { %v235_v32 = vpop.f32.mrb[0].mxu0 }
 0x1b1   :  { %v236_v33 = vadd.f32 %v513_v31, %v235_v32  ;;  %v523_v34 = vpop.f32.mrb[1].mxu0 }
 0x1b3   :  { %v428_v35 = vrot.slane %v236_v33, %v427_v23  ;;  %v421_v36 = vrot.slane %v236_v33, %v420_v24 }
 0x1b5   :  { %430 = vbcast.lane.b32.xlu1 %v428_v35, 256  ;;  %423 = vbcast.lane.b32.xlu0 %v421_v36, 256 }
 0x227   :  { %v431_v37 = vpop.permute.xlu1 %430  ;;  %v424_v38 = vpop.permute.xlu0 %423 }
 0x228   :  { %v479_v39 = vmul.f32 %v468_v26, %v431_v37  ;;  %v480_v40 = vmul.f32 %v472_v27, %v431_v37  ;;  %v477_v41 = vmul.f32 %v460_v29, %v424_v38  ;;  %v478_v42 = vmul.f32 %v464_v30, %v424_v38 }
 0x22a   :  { %v483_v43 = vadd.f32 %v479_v39, %v804_v7  ;;  %v484_v44 = vadd.f32 %v480_v40, %v808_v9  ;;  %v481_v45 = vadd.f32 %v477_v41, %v795_v1  ;;  %v482_v46 = vadd.f32 %v478_v42, %v800_v5 }
 0x22c   :  { %v490_v47 = vcombine.low %v483_v43, %v484_v44  ;;  %v489_v48 = vcombine.low %v481_v45, %v482_v46 }
 0x22e   :  { %494 = vst [vmem:[#allocation8 + $0x8] sm:$0xff] %v490_v47  ;;  %493 = vst [vmem:[#allocation8] sm:$0xff] %v489_v48 }
 0x22f   :  { %688 = shalt.err (!%p685_p0)
}
 0x230   :  { %s689_s14 = scalar_lea.hbm %s868_s5, 256 }
 0x231   :  { %p690_p1 = scmp.ne.s32.totalorder %s868_s5, %s689_s14  ;;  %p693_p2 = scmp.lt.u32.totalorder %s689_s14, %s868_s5 }
 0x233   :  { %p695_p3 = pnand %p693_p2, %p690_p1 }
 0x235   :  { %698 = shalt.err (!%p695_p3)
}
 0x236   :  { %506 = dma.vmem_to_hbm [thread:$0]  %s501_s11, 256, %s868_s5, [#allocation4], %s707_s30, %s707_s30, %s708_s6  }
 0x237   :  { %703 = dma.done.wait [#allocation4], 256  }
 0x238   :  { %704 = vsyncadd [#allocation4], 4294967040 }
 0x239   :  { %510 = vsyncpa [#allocation3], 1 }
 0x23a   :  { %511 = vsyncpa [#allocation6], 1 }
 0x23b   :  { %512 = vsyncpa [#allocation4], 1 }

</bundles_post_ra>
